<compile_context>
chip_gen: v7x
topology: tpu7x:2x2x1
jax: 0.10.0
libtpu: 0.0.40
codegen_flags: <defaults>
</compile_context>

<pallas_src>
import math

import numpy as np

import jax
import jax.numpy as jnp
from jax.experimental import pallas as pl
from jax.experimental.pallas import tpu as pltpu


# Storage dtype for x as seen by both kernels.  bf16 halves HBM traffic (~2x end-to-end
# for this mem-bound kernel) but breaks the tight f32 tolerance; see header note.
X_DTYPE = jnp.float32


# --------------------------------------------------------------------------------------
# Wrapper-side construction of the exact conv-as-matrix operators.
# Banded construction: O(K*D*L) index work, no dense O(L^2) scatter tensor.
# --------------------------------------------------------------------------------------
def _conv1_matrix(w1, L):
    """(L*D, C1*L) matrix M1 with (x_flat @ M1)[:, oc*L + lo] == Conv1d(w1, pad=K//2).

    x_flat rows are channels-last flattened: column index = l*D + ic."""
    C1, D, K = w1.shape
    pad = K // 2
    rows, cols, taps = [], [], []
    for oc in range(C1):
        for ic in range(D):
            for k in range(K):
                sh = k - pad
                lo = np.arange(max(0, -sh), min(L, L - sh))
                li = lo + sh
                rows.append(li * D + ic)
                cols.append(oc * L + lo)
                taps.append(np.full(lo.shape, (oc * D + ic) * K + k, np.int64))
    rows = np.concatenate(rows)
    cols = np.concatenate(cols)
    taps = np.concatenate(taps)
    vals = w1.astype(jnp.float32).reshape(-1)[taps]
    return jnp.zeros((L * D, C1 * L), jnp.float32).at[rows, cols].set(vals)


def _conv2_matrix(w2, L):
    """(C1*L, C2*L) matrix M2 with (h @ M2)[:, oc*L + lo] == Conv1d(w2, pad=K//2).

    h columns are channel-major (ic*L + l), matching _conv1_matrix's output layout."""
    C2, C1, K = w2.shape
    pad = K // 2
    rows, cols, taps = [], [], []
    for oc in range(C2):
        for ic in range(C1):
            for k in range(K):
                sh = k - pad
                lo = np.arange(max(0, -sh), min(L, L - sh))
                li = lo + sh
                rows.append(ic * L + li)
                cols.append(oc * L + lo)
                taps.append(np.full(lo.shape, (oc * C1 + ic) * K + k, np.int64))
    rows = np.concatenate(rows)
    cols = np.concatenate(cols)
    taps = np.concatenate(taps)
    vals = w2.astype(jnp.float32).reshape(-1)[taps]
    return jnp.zeros((C1 * L, C2 * L), jnp.float32).at[rows, cols].set(vals)


# --------------------------------------------------------------------------------------
# Kernel 1: conv1+ReLU -> conv2+ReLU -> Linear+tanh -> Vc·(.)   (all matmuls on the MXU)
# Emits scores lane-dense as a (1, TM) row per grid step.
# --------------------------------------------------------------------------------------
def score_kernel(x_ref, m1_ref, b1_ref, m2_ref, b2_ref, wt_ref, wb_ref, vc_ref, s_ref):
    x = x_ref[...].astype(jnp.float32)                                  # (TM, L*D)
    # conv1 (4->2, k3, p1) + ReLU  -- banded matrix, zero padding folded into zeros
    h = jnp.maximum(
        jnp.dot(x, m1_ref[...], preferred_element_type=jnp.float32) + b1_ref[...], 0.0)
    # conv2 (2->1, k5, p2) + ReLU  (nn.Dropout == identity in eval mode)
    g = jnp.maximum(
        jnp.dot(h, m2_ref[...], preferred_element_type=jnp.float32) + b2_ref[...], 0.0)
    # Linear (L -> 64) + tanh      (tanh lives on the EUP slot; bf16 EUP path is an
    # option on v7x if a bundle dump ever shows the EUP binding after bandwidth fixes)
    t = jnp.tanh(
        jnp.dot(g, wt_ref[...], preferred_element_type=jnp.float32) + wb_ref[...])
    # score = Vc · tanh(...); pad M to a full sublane tile (8) and keep row 0 so the
    # output store is a lane-dense (1, TM) row instead of a masked (TM, 1) column.
    vc8 = jnp.broadcast_to(vc_ref[...], (8, vc_ref.shape[1]))           # (8, 64)
    s8 = jax.lax.dot_general(vc8, t, (((1,), (1,)), ((), ())),
                             preferred_element_type=jnp.float32)        # (8, TM)
    s_ref[...] = s8[0:1, :]                                             # (1, TM)


# --------------------------------------------------------------------------------------
# Kernel 2: per-batch softmax over N (scrambled scores) + weighted sum over N,
# batched over TB batches per grid step (large contiguous DMAs, fewer steps).
# --------------------------------------------------------------------------------------
def weighted_sum_kernel(a_ref, x_ref, o_ref):
    a = a_ref[...]                                                      # (TB, 1, N)
    m = jnp.max(a, axis=-1, keepdims=True)
    e = jnp.exp(a - m)
    # Exact reciprocal keeps the tight f32 tolerance; approx=True moves it onto the EUP.
    w = e * pl.reciprocal(jnp.sum(e, axis=-1, keepdims=True), approx=False)  # (TB, 1, N)
    x = x_ref[...].astype(jnp.float32)                                  # (TB, N, F)
    # Pad M to a full sublane tile (8) and keep row 0 (compute is negligible here).
    w8 = jnp.broadcast_to(w, (w.shape[0], 8, w.shape[2]))               # (TB, 8, N)
    r = jnp.einsum("bqn,bnf->bqf", w8, x,
                   preferred_element_type=jnp.float32)                  # (TB, 8, F)
    o_ref[...] = r[:, 0:1, :]                                           # (TB, 1, F)


# --------------------------------------------------------------------------------------
# Tile / budget helpers
# --------------------------------------------------------------------------------------
def _vmem_limit_bytes():
    """~3/4 of physical VMEM: 96 MiB on 128-MiB v5e/v6e, 48 MiB on 64-MiB v7x."""
    cap = 64 * 1024 * 1024
    try:
        cap = int(pltpu.get_tpu_info().vmem_capacity_bytes)
    except Exception:
        pass
    return int(min(cap * 3 // 4, 96 * 1024 * 1024))


def _pick_bn_tile(bn, row_bytes):
    """Row tile for the score kernel.

    - f-aware: whole live f32 chain per tile capped at ~3 MiB, tm <= 2048.
    - lane-legal: multiples of 128 (so the (1, tm) score store is unmasked) that
      divide bn; falls back to a full-array block only for tiny bn (< 128).
    - grid-aware: prefers tiles leaving >= 8 grid steps so the BlockSpec pipeline has
      DMA/compute overlap and v7x megacore gets parallel steps."""
    if bn < 128:
        return bn
    cap = min(2048, max(128, (3 * 1024 * 1024) // max(1, row_bytes)))
    cap = max(128, (cap // 128) * 128)
    cands = [t for t in range(128, cap + 1, 128) if bn % t == 0]
    if not cands:
        return bn
    piped = [t for t in cands if bn // t >= 8]
    return max(piped) if piped else max(cands)


def _pick_batch_tile(b, slab_bytes):
    """Batch tile for the weighted-sum kernel: TB*slab ~<= 4 MiB, TB divides b,
    and >= 8 grid steps are kept when b allows it."""
    cap = max(1, min(b, (4 * 1024 * 1024) // max(1, slab_bytes)))
    if b >= 8 and b // cap < 8:
        cap = max(1, b // 8)
    for t in range(cap, 0, -1):
        if b % t == 0:
            return t
    return 1


# --------------------------------------------------------------------------------------
# Wrapper
# --------------------------------------------------------------------------------------
def weight_forward(x, params):
    b, n, l, d = x.shape
    bn = b * n
    f = l * d
    c1 = params["w1"].shape[0]        # 2
    nh = params["W"].shape[0]         # 64
    x_itemsize = jnp.dtype(X_DTYPE).itemsize

    # Tiny operator matrices / row-vectors (one-time, banded construction).
    m1 = _conv1_matrix(params["w1"], l)                                  # (L*D, C1*L)
    m2 = _conv2_matrix(params["w2"], l)                                  # (C1*L, L)
    b1row = jnp.repeat(params["b1"].astype(jnp.float32), l).reshape(1, c1 * l)
    b2row = jnp.repeat(params["b2"].astype(jnp.float32), l).reshape(1, l)
    wt = params["W"].astype(jnp.float32).T                               # (L, 64)
    wb = params["bias"].astype(jnp.float32).reshape(1, nh)
    vc = params["Vc"].astype(jnp.float32).reshape(1, nh)

    vmem_limit = _vmem_limit_bytes()
    cp = pltpu.CompilerParams(dimension_semantics=("parallel",),
                              vmem_limit_bytes=vmem_limit)

    # ---------------- Kernel 1: scores for every (batch, noise) row -----------------
    # x enters via a free (bitcast) reshape -- no transpose copy in HBM.
    x2d = x.reshape(bn, f).astype(X_DTYPE)                               # (BN, L*D)
    if bn >= 128 and bn % 128 != 0:
        # Pad to a lane-aligned row count so 128-multiple tiles (and an unmasked score
        # store) are always available; padded rows are finite and sliced away below.
        bn_pad = ((bn + 127) // 128) * 128
        x2d = jnp.pad(x2d, ((0, bn_pad - bn), (0, 0)))
    else:
        bn_pad = bn

    # Live f32 chain per row inside kernel 1: x(f) + h(c1*l) + g(l) + t(nh) + s8 slice.
    row_bytes = 4 * (f + c1 * l + l + nh + 8)
    tm = _pick_bn_tile(bn_pad, row_bytes)

    # Footprint sanity (weights double-buffered + x tile double-buffered + chain).
    k1_bytes = (8 * (f * c1 * l + c1 * l * l + l * nh + c1 * l + l + 2 * nh)
                + 2 * tm * f * x_itemsize + tm * row_bytes)
    assert k1_bytes < vmem_limit, ("score kernel tile exceeds VMEM budget", k1_bytes)

    def _full(shape):
        return pl.BlockSpec(shape, lambda *_: (0,) * len(shape))

    scores = pl.pallas_call(
        score_kernel,
        out_shape=jax.ShapeDtypeStruct((1, bn_pad), jnp.float32),
        grid=(bn_pad // tm,),
        in_specs=[
            pl.BlockSpec((tm, f), lambda i: (i, 0)),
            _full((f, c1 * l)),
            _full((1, c1 * l)),
            _full((c1 * l, l)),
            _full((1, l)),
            _full((l, nh)),
            _full((1, nh)),
            _full((1, nh)),
        ],
        out_specs=pl.BlockSpec((1, tm), lambda i: (0, i)),
        compiler_params=cp,
    )(x2d, m1, b1row, m2, b2row, wt, wb, vc)                             # (1, BN_pad)

    # PyTorch: tanh(...).permute(2,1,0).reshape(64, b*n); mm(Vc,·).reshape(b, n)
    # => static scramble of the (b, n) score matrix (O(BN) glue in the wrapper).
    a_scr = scores[:, :bn].reshape(b, n).T.reshape(b, 1, n)              # (B, 1, N)

    # ---------------- Kernel 2: scrambled softmax + weighted sum --------------------
    x3 = x.reshape(b, n, f).astype(X_DTYPE)                              # (B, N, L*D)
    slab = n * f * x_itemsize                                            # x bytes / batch
    tb = _pick_batch_tile(b, slab)
    assert 2 * (tb * slab + tb * n * 4) + (2 << 20) < vmem_limit, (
        "weighted-sum block exceeds VMEM budget; needs an n-tile running softmax")

    out = pl.pallas_call(
        weighted_sum_kernel,
        out_shape=jax.ShapeDtypeStruct((b, 1, f), jnp.float32),
        grid=(b // tb,),
        in_specs=[
            pl.BlockSpec((tb, 1, n), lambda i: (i, 0, 0)),
            pl.BlockSpec((tb, n, f), lambda i: (i, 0, 0)),
        ],
        out_specs=pl.BlockSpec((tb, 1, f), lambda i: (i, 0, 0)),
        compiler_params=cp,
    )(a_scr, x3)                                                         # (B, 1, L*D)

    return out.reshape(b, l, d)


# --------------------------------------------------------------------------------------
# Deterministic parameter init (PyTorch-style uniform bounds)
# --------------------------------------------------------------------------------------
def init_params(key, noise_length):
    ks = jax.random.split(key, 7)
    L = noise_length

    bnd1 = 1.0 / math.sqrt(4 * 3)    # conv1 fan_in
    bnd2 = 1.0 / math.sqrt(2 * 5)    # conv2 fan_in
    bndw = 1.0 / math.sqrt(L)        # linear fan_in

    return {
        "w1":   jax.random.uniform(ks[0], (2, 4, 3), jnp.float32, -bnd1, bnd1),
        "b1":   jax.random.uniform(ks[1], (2,),      jnp.float32, -bnd1, bnd1),
        "w2":   jax.random.uniform(ks[2], (1, 2, 5), jnp.float32, -bnd2, bnd2),
        "b2":   jax.random.uniform(ks[3], (1,),      jnp.float32, -bnd2, bnd2),
        "W":    jax.random.uniform(ks[4], (64, L),   jnp.float32, -bndw, bndw),
        "bias": jax.random.uniform(ks[5], (64,),     jnp.float32, -bndw, bndw),
        "Vc":   jax.random.uniform(ks[6], (64,),     jnp.float32, -bndw, bndw),
    }


# --------------------------------------------------------------------------------------
# Pure-JAX reference (mirrors the PyTorch forward exactly)
# --------------------------------------------------------------------------------------
def _conv1d_ref(x, w, bias, pad):
    # x: (N, Cin, L), w: (Cout, Cin, K)
    N, Cin, L = x.shape
    K = w.shape[2]
    xp = jnp.pad(x, ((0, 0), (0, 0), (pad, pad)))
    cols = jnp.stack([xp[:, :, k:k + L] for k in range(K)], axis=-1)   # (N, Cin, L, K)
    return jnp.einsum("nclk,ock->nol", cols, w) + bias[None, :, None]


def reference_forward(x, p):
    b, n, l, d = x.shape
    xc = jnp.transpose(x.reshape(b * n, l, d), (0, 2, 1))              # (BN, d, l)
    h = jnp.maximum(_conv1d_ref(xc, p["w1"], p["b1"], pad=1), 0.0)
    g = jnp.maximum(_conv1d_ref(h, p["w2"], p["b2"], pad=2), 0.0)      # (BN, 1, l)
    c = g.reshape(b, n, l)
    t = jnp.tanh(jnp.einsum("bnl,ol->bno", c, p["W"]) + p["bias"])     # (b, n, 64)
    s = jnp.einsum("o,bno->bn", p["Vc"], t)                            # (b, n)
    a = jax.nn.softmax(s.T.reshape(b, n), axis=1)                      # scrambled reshape
    return jnp.sum(a[:, :, None, None] * x, axis=1)                    # (b, l, d)


if __name__ == "__main__":
    b, n, l, d = 2, 8, 16, 4          # noise_length = l = 16, in_channels = d = 4
    key = jax.random.PRNGKey(0)
    kx, kp = jax.random.split(key)

    x = jax.random.normal(kx, (b, n, l, d), jnp.float32)
    params = init_params(kp, noise_length=l)

    out = jax.block_until_ready(weight_forward(x, params))
    ref = jax.block_until_ready(reference_forward(x, params))

    assert out.shape == (b, l, d), out.shape
    err = float(jnp.max(jnp.abs(out - ref)))
    assert jnp.allclose(out, ref, rtol=5e-4, atol=5e-5), err
    print("KERNEL_OK")
</pallas_src>

<mosaic_0001>
module attributes {stable_mosaic.version = 11 : i64} {
  func.func @score_kernel(%arg0: i32, %arg1: memref<16x64xf32, #tpu.memory_space<vmem>>, %arg2: memref<64x32xf32, #tpu.memory_space<vmem>>, %arg3: memref<1x32xf32, #tpu.memory_space<vmem>>, %arg4: memref<32x16xf32, #tpu.memory_space<vmem>>, %arg5: memref<1x16xf32, #tpu.memory_space<vmem>>, %arg6: memref<16x64xf32, #tpu.memory_space<vmem>>, %arg7: memref<1x64xf32, #tpu.memory_space<vmem>>, %arg8: memref<1x64xf32, #tpu.memory_space<vmem>>, %arg9: memref<1x16xf32, #tpu.memory_space<vmem>>) attributes {dimension_semantics = [#tpu.dimension_semantics<parallel>], iteration_bounds = array<i64: 1>, scalar_prefetch = 0 : i64, scratch_operands = 0 : i64, tpu.core_type = #tpu.core_type<tc>, window_params = [{transform_indices = @transform_0, window_bounds = array<i64: 16, 64>}, {pipeline_mode = #tpu.pipeline_mode<synchronous>, transform_indices = @transform_1, window_bounds = array<i64: 64, 32>}, {pipeline_mode = #tpu.pipeline_mode<synchronous>, transform_indices = @transform_2, window_bounds = array<i64: 1, 32>}, {pipeline_mode = #tpu.pipeline_mode<synchronous>, transform_indices = @transform_3, window_bounds = array<i64: 32, 16>}, {pipeline_mode = #tpu.pipeline_mode<synchronous>, transform_indices = @transform_4, window_bounds = array<i64: 1, 16>}, {pipeline_mode = #tpu.pipeline_mode<synchronous>, transform_indices = @transform_5, window_bounds = array<i64: 16, 64>}, {pipeline_mode = #tpu.pipeline_mode<synchronous>, transform_indices = @transform_6, window_bounds = array<i64: 1, 64>}, {pipeline_mode = #tpu.pipeline_mode<synchronous>, transform_indices = @transform_7, window_bounds = array<i64: 1, 64>}, {transform_indices = @transform_8, window_bounds = array<i64: 1, 16>}]} {
    %c0 = arith.constant 0 : index
    %c0_0 = arith.constant 0 : index
    %0 = vector.load %arg1[%c0, %c0_0] : memref<16x64xf32, #tpu.memory_space<vmem>>, vector<16x64xf32>
    %c0_1 = arith.constant 0 : index
    %c0_2 = arith.constant 0 : index
    %1 = vector.load %arg2[%c0_1, %c0_2] : memref<64x32xf32, #tpu.memory_space<vmem>>, vector<64x32xf32>
    %cst = arith.constant dense<0.000000e+00> : vector<16x32xf32>
    %2 = tpu.matmul %0, %1, %cst {dimension_numbers = #tpu.dot_dimension_numbers<[1], [0], [0], [1], [0, 0, 1, 1], [], []>} : vector<16x64xf32>, vector<64x32xf32>, vector<16x32xf32> -> vector<16x32xf32>
    %c0_3 = arith.constant 0 : index
    %c0_4 = arith.constant 0 : index
    %3 = vector.load %arg3[%c0_3, %c0_4] : memref<1x32xf32, #tpu.memory_space<vmem>>, vector<1x32xf32>
    %4 = vector.broadcast %3 : vector<1x32xf32> to vector<16x32xf32>
    %5 = arith.addf %2, %4 : vector<16x32xf32>
    %cst_5 = arith.constant 0.000000e+00 : f32
    %6 = vector.broadcast %cst_5 : f32 to vector<16x32xf32>
    %7 = arith.maximumf %5, %6 : vector<16x32xf32>
    %c0_6 = arith.constant 0 : index
    %c0_7 = arith.constant 0 : index
    %8 = vector.load %arg4[%c0_6, %c0_7] : memref<32x16xf32, #tpu.memory_space<vmem>>, vector<32x16xf32>
    %cst_8 = arith.constant dense<0.000000e+00> : vector<16x16xf32>
    %9 = tpu.matmul %7, %8, %cst_8 {dimension_numbers = #tpu.dot_dimension_numbers<[1], [0], [0], [1], [0, 0, 1, 1], [], []>} : vector<16x32xf32>, vector<32x16xf32>, vector<16x16xf32> -> vector<16x16xf32>
    %c0_9 = arith.constant 0 : index
    %c0_10 = arith.constant 0 : index
    %10 = vector.load %arg5[%c0_9, %c0_10] : memref<1x16xf32, #tpu.memory_space<vmem>>, vector<1x16xf32>
    %11 = vector.broadcast %10 : vector<1x16xf32> to vector<16x16xf32>
    %12 = arith.addf %9, %11 : vector<16x16xf32>
    %cst_11 = arith.constant 0.000000e+00 : f32
    %13 = vector.broadcast %cst_11 : f32 to vector<16x16xf32>
    %14 = arith.maximumf %12, %13 : vector<16x16xf32>
    %c0_12 = arith.constant 0 : index
    %c0_13 = arith.constant 0 : index
    %15 = vector.load %arg6[%c0_12, %c0_13] : memref<16x64xf32, #tpu.memory_space<vmem>>, vector<16x64xf32>
    %cst_14 = arith.constant dense<0.000000e+00> : vector<16x64xf32>
    %16 = tpu.matmul %14, %15, %cst_14 {dimension_numbers = #tpu.dot_dimension_numbers<[1], [0], [0], [1], [0, 0, 1, 1], [], []>} : vector<16x16xf32>, vector<16x64xf32>, vector<16x64xf32> -> vector<16x64xf32>
    %c0_15 = arith.constant 0 : index
    %c0_16 = arith.constant 0 : index
    %17 = vector.load %arg7[%c0_15, %c0_16] : memref<1x64xf32, #tpu.memory_space<vmem>>, vector<1x64xf32>
    %18 = vector.broadcast %17 : vector<1x64xf32> to vector<16x64xf32>
    %19 = arith.addf %16, %18 : vector<16x64xf32>
    %20 = math.tanh %19 : vector<16x64xf32>
    %c0_17 = arith.constant 0 : index
    %c0_18 = arith.constant 0 : index
    %21 = vector.load %arg8[%c0_17, %c0_18] : memref<1x64xf32, #tpu.memory_space<vmem>>, vector<1x64xf32>
    %22 = vector.shape_cast %21 : vector<1x64xf32> to vector<1x64xf32>
    %23 = vector.broadcast %22 : vector<1x64xf32> to vector<8x64xf32>
    %cst_19 = arith.constant dense<0.000000e+00> : vector<8x16xf32>
    %24 = tpu.matmul %23, %20, %cst_19 {dimension_numbers = #tpu.dot_dimension_numbers<[1], [1], [0], [0], [0, 0, 1, 0], [], []>} : vector<8x64xf32>, vector<16x64xf32>, vector<8x16xf32> -> vector<8x16xf32>
    %25 = vector.extract_strided_slice %24 {offsets = [0, 0], sizes = [1, 16], strides = [1, 1]} : vector<8x16xf32> to vector<1x16xf32>
    %c0_20 = arith.constant 0 : index
    %c0_21 = arith.constant 0 : index
    %26 = vector.load %arg9[%c0_20, %c0_21] : memref<1x16xf32, #tpu.memory_space<vmem>>, vector<1x16xf32>
    tpu.vector_store %arg9[%c0_20, %c0_21], %25 {strides = array<i32>} : memref<1x16xf32, #tpu.memory_space<vmem>>, vector<1x16xf32>,
    return
  }
  func.func @transform_0(%arg0: i32) -> (i32, i32) {
    %c0_i32 = arith.constant 0 : i32
    %c0_i32_0 = arith.constant 0 : i32
    return %arg0, %c0_i32 : i32, i32
  }
  func.func @transform_1(%arg0: i32) -> (i32, i32) {
    %c0_i32 = arith.constant 0 : i32
    %c0_i32_0 = arith.constant 0 : i32
    %c0_i32_1 = arith.constant 0 : i32
    return %c0_i32, %c0_i32_0 : i32, i32
  }
  func.func @transform_2(%arg0: i32) -> (i32, i32) {
    %c0_i32 = arith.constant 0 : i32
    %c0_i32_0 = arith.constant 0 : i32
    %c0_i32_1 = arith.constant 0 : i32
    return %c0_i32, %c0_i32_0 : i32, i32
  }
  func.func @transform_3(%arg0: i32) -> (i32, i32) {
    %c0_i32 = arith.constant 0 : i32
    %c0_i32_0 = arith.constant 0 : i32
    %c0_i32_1 = arith.constant 0 : i32
    return %c0_i32, %c0_i32_0 : i32, i32
  }
  func.func @transform_4(%arg0: i32) -> (i32, i32) {
    %c0_i32 = arith.constant 0 : i32
    %c0_i32_0 = arith.constant 0 : i32
    %c0_i32_1 = arith.constant 0 : i32
    return %c0_i32, %c0_i32_0 : i32, i32
  }
  func.func @transform_5(%arg0: i32) -> (i32, i32) {
    %c0_i32 = arith.constant 0 : i32
    %c0_i32_0 = arith.constant 0 : i32
    %c0_i32_1 = arith.constant 0 : i32
    return %c0_i32, %c0_i32_0 : i32, i32
  }
  func.func @transform_6(%arg0: i32) -> (i32, i32) {
    %c0_i32 = arith.constant 0 : i32
    %c0_i32_0 = arith.constant 0 : i32
    %c0_i32_1 = arith.constant 0 : i32
    return %c0_i32, %c0_i32_0 : i32, i32
  }
  func.func @transform_7(%arg0: i32) -> (i32, i32) {
    %c0_i32 = arith.constant 0 : i32
    %c0_i32_0 = arith.constant 0 : i32
    %c0_i32_1 = arith.constant 0 : i32
    return %c0_i32, %c0_i32_0 : i32, i32
  }
  func.func @transform_8(%arg0: i32) -> (i32, i32) {
    %c0_i32 = arith.constant 0 : i32
    %c0_i32_0 = arith.constant 0 : i32
    return %c0_i32, %arg0 : i32, i32
  }
}

</mosaic_0001>

<bundles_post_ra>
// kernel: tpu_custom_call.1
= control target key start
LH: loop header
LB: loop body
LE: loop exit
PB: predicated region body
PF: predicated region fallthrough
CT: control target
= control target key end

     0   :  { %vm47_vm0 = vcmask 523264   ;;  %s689_s0 = inlined_call_operand.vmem [shape: f32[16,64], index: 0, kind: input, shape index: {}]   ;;  %s690_s1 = inlined_call_operand.vmem [shape: f32[64,32], index: 1, kind: input, shape index: {}]   ;;  %s691_s2 = inlined_call_operand.vmem [shape: f32[1,32], index: 2, kind: input, shape index: {}]   ;;  %s692_s3 = inlined_call_operand.vmem [shape: f32[32,16], index: 3, kind: input, shape index: {}]   ;;  %s693_s4 = inlined_call_operand.vmem [shape: f32[1,16], index: 4, kind: input, shape index: {}]   ;;  %s694_s5 = inlined_call_operand.vmem [shape: f32[16,64], index: 5, kind: input, shape index: {}]   ;;  %s695_s6 = inlined_call_operand.vmem [shape: f32[1,64], index: 6, kind: input, shape index: {}]   ;;  %s696_s7 = inlined_call_operand.vmem [shape: f32[1,64], index: 7, kind: input, shape index: {}]   ;;  %s697_s8 = inlined_call_operand.hbm [shape: f32[1,16], index: 8, kind: output, shape index: {}]  }
   0x1   :  { %v32_v0 = vld [vmem:[%s690_s1] sm:$0xff]  ;;  %v33_v1 = vld [vmem:[%s690_s1 + $0x8] sm:$0xff]  ;;  %v34_v2 = vld [vmem:[%s690_s1 + $0x10] sm:$0xff] }
   0x2   :  { %v499_v3 = vpack.c.bf16 %v33_v1, %v32_v0  ;;  %v35_v4 = vld [vmem:[%s690_s1 + $0x18] sm:$0xff]  ;;  %v36_v6 = vld [vmem:[%s690_s1 + $0x20] sm:$0xff]  ;;  %v37_v7 = vld [vmem:[%s690_s1 + $0x28] sm:$0xff] }
   0x3   :  { %v503_v5 = vpack.c.bf16 %v35_v4, %v34_v2  ;;  %v30_v8 = vld [vmem:[%s689_s0] sm:$0xff]  ;;  %v132_v10 = vld [vmem:[%s692_s3 + $0x8] sm:$0xff] }
   0x4   :  { %500 = vmatprep.subr.bf16.mxu0 %v499_v3  ;;  %471 = vmatprep.mubr.msk.f32.mxu0 %vm47_vm0, %v30_v8  ;;  %v131_v9 = vld [vmem:[%s692_s3] sm:$0xff] }
   0x5   :  { %502 = vmatpush3.bf16.msra.mxu0 %v499_v3  ;;  %v515_v11 = vpack.c.bf16 %v132_v10, %v131_v9 }
   0x6   :  { %13 = vsyncpa [#allocation3], 0  ;;  %504 = vmatprep.subr.bf16.mxu0 %v503_v5  ;;  %v507_v12 = vpack.c.bf16 %v37_v7, %v36_v6  ;;  %v38_v13 = vld [vmem:[%s690_s1 + $0x30] sm:$0xff]  ;;  %v39_v14 = vld [vmem:[%s690_s1 + $0x38] sm:$0xff]  ;;  %vm142_vm1 = vcmask 261120   ;;  %vm235_vm2 = vcmask 130048  }
   0x7   :  { %516 = vmatprep.subr.bf16.mxu1 %v515_v11  ;;  %v511_v15 = vpack.c.bf16 %v39_v14, %v38_v13  ;;  %v31_v16 = vld [vmem:[%s689_s0 + $0x8] sm:$0xff]  ;;  %v133_v17 = vld [vmem:[%s692_s3 + $0x10] sm:$0xff]  ;;  %v134_v18 = vld [vmem:[%s692_s3 + $0x18] sm:$0xff]  ;;  %v563_v37 = vmov 0.0|0.0   ;;  %vm564_vm3 = vmmov 0   ;;  %v565_v38 = vmov 0.0  }
   0x8   :  { %518 = vmatpush3.bf16.msra.mxu1 %v515_v11  ;;  %v519_v19 = vpack.c.bf16 %v134_v18, %v133_v17  ;;  %v419_v20 = vld [vmem:[%s691_s2] ss:$0 sm:$0xff]  ;;  %v227_v28 = vld [vmem:[%s694_s5 + $0x8] sm:$0xff]  ;;  %vm529_vm4 = vmpackc.low %vm47_vm0, %vm47_vm0  ;;  %vm403_vm5 = vcmask 122880  }
   0x9   :  { %506 = vmatpush3.bf16.msra.mxu0 %v503_v5  ;;  %v226_v27 = vld [vmem:[%s694_s5] sm:$0xff] }
   0xa   :  { %508 = vmatprep.subr.bf16.mxu0 %v507_v12  ;;  %520 = vmatprep.subr.bf16.mxu1 %v519_v19  ;;  %v523_v29 = vpack.c.bf16 %v227_v28, %v226_v27  ;;  %v422_v30 = vld [vmem:[%s693_s4] ss:$0 sm:$0xff] }
   0xb   :  { %v425_v39 = vld [vmem:[%s695_s6] ss:$0 sm:$0xff]  ;;  %s566_s6 = smov [#allocation2]  }
   0xc   :  { %522 = vmatpush3.bf16.msra.mxu1 %v519_v19  ;;  %v428_v47 = vld [vmem:[%s696_s7] ss:$0 sm:$0xff]  ;;  %s411_s17 = sshll.u32 %s566_s6, 4  ;;  %s412_s17 = int_to_ptr.vmem [resolvable:$true] %s411_s17 }
   0xd   :  { %510 = vmatpush3.bf16.msra.mxu0 %v507_v12  ;;  %524 = vmatprep.subr.bf16.mxu1 %v523_v29  ;;  %s539_s18 = scalar_lea.vmem %s412_s17, 16  ;;  %s543_s19 = scalar_lea.vmem %s412_s17, 32 }
   0xe   :  { %512 = vmatprep.subr.bf16.mxu0 %v511_v15  ;;  %p540_p0 = scmp.ne.s32.totalorder %s412_s17, %s539_s18  ;;  %p544_p1 = scmp.lt.s32.totalorder %s412_s17, %s412_s17 }
   0xf   :  { %p545_p2 = scmp.lt.s32.totalorder %s543_s19, %s539_s18 }
  0x11   :  { %514 = vmatpush3.bf16.msra.mxu0 %v511_v15  ;;  %p546_p3 = por %p545_p2, %p544_p1 }
  0x13   :  { %p547_p4 = pnand %p546_p3, %p540_p0 }
  0x14   :  { %472 = vmatmul.mubr.msk.f32.vlgmr.msra.gmra.mrb[0].mxu0 %vm47_vm0, %v31_v16 }
  0xe7   :  { %v473_v21 = vpop.f32.mrb[0].mxu0 }
  0xe8   :  { %v126_v22 = vadd.f32 %v473_v21, %v419_v20  ;;  %v120_v23 = vpop.f32.mrb[1].mxu0 }
  0xe9   :  { %v121_v24 = vadd.f32 %v419_v20, %v120_v23 }
  0xea   :  { %v130_v26 = vmax.f32 %v126_v22, 0.0 }
  0xeb   :  { %v129_v25 = vmax.f32 %v121_v24, 0.0 }
  0xed   :  { %482 = vmatprep.mubr.msk.f32.mxu1 %vm142_vm1, %v129_v25 }
  0xee   :  { %483 = vmatmul.mubr.msk.f32.vlgmr.msra.gmra.mrb[0].mxu1 %vm142_vm1, %v130_v26 }
  0xef   :  { %526 = vmatpush3.bf16.msra.mxu1 %v523_v29 }
  0xf0   :  { %527 = vmatprep.subr.bf16.mxu1 %v563_v37 }
 0x1c1   :  { %v484_v31 = vpop.f32.mrb[0].mxu1 }
 0x1c2   :  { %v221_v32 = vadd.f32 %v484_v31, %v422_v30  ;;  %v215_v33 = vpop.f32.mrb[1].mxu1 }
 0x1c3   :  { %v216_v34 = vadd.f32 %v422_v30, %v215_v33 }
 0x1c4   :  { %v225_v36 = vmax.f32 %v221_v32, 0.0 }
 0x1c5   :  { %v224_v35 = vmax.f32 %v216_v34, 0.0 }
 0x1c7   :  { %489 = vmatprep.mubr.msk.f32.mxu1 %vm235_vm2, %v224_v35 }
 0x1c8   :  { %490 = vmatmul.mubr.msk.f32.vlgmr.msra.gmra.mrb[2].mxu1 %vm235_vm2, %v225_v36 }
 0x1c9   :  { %496 = vmatprep.mubr.msk.f32.mxu1 %vm564_vm3, %v565_v38 }
 0x29b   :  { %v491_v40 = vpop.f32.mrb[2].mxu1 }
 0x29c   :  { %v314_v41 = vadd.f32 %v491_v40, %v425_v39  ;;  %v308_v42 = vpop.f32.mrb[3].mxu1 }
 0x29d   :  { %v309_v43 = vadd.f32 %v425_v39, %v308_v42 }
 0x29e   :  { %535 = vtanh.f32 %v314_v41 }
 0x29f   :  { %537 = vtanh.f32 %v309_v43 }
 0x2a8   :  { %v536_v44 = vpop.eup %535 }
 0x2a9   :  { %v538_v45 = vpop.eup %537 }
 0x2aa   :  { %v528_v46 = vpack.c.bf16 %v536_v44, %v538_v45 }
 0x2ac   :  { %530 = vmatpush3.bf16.xpose.msk.msra.mxu1 %vm529_vm4, %v528_v46 }
 0x2b3   :  { %497 = vmatmul.mubr.msk.f32.vlgmr.msra.gmra.mrb[4].mxu1 %vm47_vm0, %v428_v47 }
 0x386   :  { %v399_v48 = vpop.f32.mrb[4].mxu1 }
 0x387   :  { %404 = vst.msk [vmem:[#allocation2] sm:$0x1] %vm403_vm5, %v399_v48  ;;  %v498_v49 = vpop.f32.mrb[5].mxu1 }
 0x388   :  { %550 = shalt.err (!%p547_p4)
}
 0x389   :  { %s551_s7 = scalar_lea.hbm %s697_s8, 16 }
 0x38a   :  { %p552_p5 = scmp.ne.s32.totalorder %s697_s8, %s551_s7  ;;  %p555_p6 = scmp.lt.u32.totalorder %s551_s7, %s697_s8 }
 0x38c   :  { %p557_p7 = pnand %p555_p6, %p552_p5 }
 0x38e   :  { %560 = shalt.err (!%p557_p7)
}
 0x38f   :  { %414 = dma.vmem_to_hbm [thread:$0]  %s412_s17, 16, %s697_s8, [#allocation3]  }
 0x390   :  { %561 = dma.done.wait [#allocation3], 16  }
 0x391   :  { %562 = vsyncadd [#allocation3], 4294967280 }
 0x392   :  { %418 = vsyncpa [#allocation3], 1 }

</bundles_post_ra>
